<compile_context>
chip_gen: v7x
topology: tpu7x:2x2x1
jax: 0.10.0
libtpu: 0.0.40
codegen_flags: <defaults>
</compile_context>

<pallas_src>
import functools

import jax
import jax.numpy as jnp
from jax.experimental import pallas as pl
from jax.experimental.pallas import tpu as pltpu


# ----------------------------------------------------------------------------
# small helpers
# ----------------------------------------------------------------------------
def _round_up(x, m):
    return (x + m - 1) // m * m


def _pick_tile(n, target, mult):
    """Largest divisor of n that is <= target and a multiple of `mult`; else n (full dim)."""
    if n <= target:
        return n
    for t in range(target, 0, -1):
        if n % t == 0 and t % mult == 0:
            return t
    return n


# ----------------------------------------------------------------------------
# Pallas kernel 1: farthest point sampling, lane-dense transposed layout.
# xyz is kept as (8, N): coords on sublanes (3 real + 5 zero pad), points on lanes.
# Per iteration everything is (1,N)/(8,N) shaped -> full 128-lane vregs instead of
# the 1-lane-per-vreg (N,1) column layout.  Sampled coords are emitted transposed
# (8, S) and the centroid is scattered into its column with a one-hot select, so
# there are no dynamic-index stores.
# ----------------------------------------------------------------------------
def _fps_kernel(xyzt_ref, newxyzt_ref, dist_ref):
    # xyzt_ref: (1, 8, N); newxyzt_ref: (1, 8, S); dist_ref: (1, N) running min sq-dist.
    N = xyzt_ref.shape[2]
    S = newxyzt_ref.shape[2]
    lane_n = jax.lax.broadcasted_iota(jnp.int32, (1, N), 1)
    lane_s = jax.lax.broadcasted_iota(jnp.int32, (1, S), 1)
    dist_ref[...] = jnp.full(dist_ref.shape, 1e10, dist_ref.dtype)
    newxyzt_ref[0] = jnp.zeros_like(newxyzt_ref[0])

    def body(i, farthest):                               # farthest: (1, 1) int32
        xyzt = xyzt_ref[0]                               # (8, N) -- VMEM resident, no HBM
        sel = lane_n == farthest                         # (1, N)
        # mask-sum selects exactly the `farthest` column (stays in the vector domain,
        # no vreg->sreg extraction needed for addressing).
        centroid = jnp.sum(jnp.where(sel, xyzt, 0.0), axis=1, keepdims=True)   # (8, 1)
        # scatter the centroid into output column i via a one-hot select
        newxyzt_ref[0] = jnp.where(lane_s == i, centroid, newxyzt_ref[0])
        d = jnp.sum((xyzt - centroid) ** 2, axis=0, keepdims=True)             # (1, N)
        dist = jnp.minimum(dist_ref[...], d)
        dist_ref[...] = dist
        mx = jnp.max(dist, axis=1, keepdims=True)        # (1, 1)
        nxt = jnp.min(jnp.where(dist == mx, lane_n, jnp.int32(N)),
                      axis=1, keepdims=True)             # first index of the max
        return nxt

    jax.lax.fori_loop(0, S, body, jnp.zeros((1, 1), jnp.int32))


def farthest_point_sample_coords_t(xyz_t, npoint):
    """xyz_t: (B, 8, N) -> sampled coords, transposed (B, 8, npoint)."""
    B, _, N = xyz_t.shape
    return pl.pallas_call(
        _fps_kernel,
        out_shape=jax.ShapeDtypeStruct((B, 8, npoint), jnp.float32),
        grid=(B,),
        in_specs=[pl.BlockSpec((1, 8, N), lambda b: (b, 0, 0))],
        out_specs=pl.BlockSpec((1, 8, npoint), lambda b: (b, 0, 0)),
        scratch_shapes=[pltpu.VMEM((1, N), jnp.float32)],
        compiler_params=pltpu.CompilerParams(dimension_semantics=("parallel",)),
    )(xyz_t)


# ----------------------------------------------------------------------------
# Pallas kernel 2: NEGATED pairwise squared distance
#   o[b,s,n] = -||new_xyz[b,s]-xyz[b,n]||^2
# Lane-dense layout: queries (S, 8) with coords (zero-padded) on lanes, sources
# pre-transposed to (8, N) with N on lanes -> clean (TS,8)x(8,TN) MXU dot, no
# in-kernel transposes.  Negation is folded in so lax.top_k reads this output
# directly (saves an XLA negate pass over the full B*S*N matrix).
# ----------------------------------------------------------------------------
def _neg_sqdist_kernel(a_ref, bt_ref, o_ref):
    a = a_ref[0]                                                   # (TS, 8)
    bt = bt_ref[0]                                                 # (8, TN)
    inner = jnp.dot(a, bt, preferred_element_type=jnp.float32)     # (TS, TN)
    aa = jnp.sum(a * a, axis=-1, keepdims=True)                    # (TS, 1)
    bb = jnp.sum(bt * bt, axis=0, keepdims=True)                   # (1, TN)
    o_ref[0] = -(aa - 2.0 * inner + bb)


def pairwise_neg_sqdist(new_xyz_pad, xyz_t, *, tile_s=256, tile_n=2048):
    """new_xyz_pad: (B, S, 8); xyz_t: (B, 8, N) -> (B, S, N) f32 negated sq-dists."""
    B, S, _ = new_xyz_pad.shape
    N = xyz_t.shape[2]
    ts = _pick_tile(S, tile_s, 8)
    tn = _pick_tile(N, tile_n, 128)
    return pl.pallas_call(
        _neg_sqdist_kernel,
        out_shape=jax.ShapeDtypeStruct((B, S, N), jnp.float32),
        grid=(B, S // ts, N // tn),
        in_specs=[
            pl.BlockSpec((1, ts, 8), lambda b, si, ni: (b, si, 0)),
            pl.BlockSpec((1, 8, tn), lambda b, si, ni: (b, 0, ni)),
        ],
        out_specs=pl.BlockSpec((1, ts, tn), lambda b, si, ni: (b, si, ni)),
        compiler_params=pltpu.CompilerParams(
            dimension_semantics=("parallel", "parallel", "parallel")),
    )(new_xyz_pad, xyz_t)


# ----------------------------------------------------------------------------
# Pallas kernel 3: shared MLP (1x1 conv + folded BN + ReLU) chain, then max over K.
# bf16 MXU matmuls with f32 accumulation; bias/ReLU/max stay in f32 (v5e has no
# bf16 VPU path).  Weights/biases use constant index_maps -> resident in VMEM.
# Grouped input arrives pre-cast to bf16 (half the HBM read of the dominant stream).
# ----------------------------------------------------------------------------
def _mlp_max_kernel(x_ref, *refs):
    out_ref = refs[-1]
    wb = refs[:-1]                          # (w1, b1, w2, b2, ...)
    x = x_ref[0]                            # (TS, K, Cin) bf16
    TS, K, Cin = x.shape
    h = x.reshape(TS * K, Cin)              # free relayout when K is a multiple of 8
    for i in range(0, len(wb), 2):
        w = wb[i][...]                      # (Cprev, Cnext) bf16, resident
        b = wb[i + 1][...]                  # (1, Cnext) f32
        y = jnp.dot(h.astype(jnp.bfloat16), w, preferred_element_type=jnp.float32)
        h = jnp.maximum(y + b, 0.0)
    h = h.reshape(TS, K, h.shape[-1])
    out_ref[0] = jnp.max(h, axis=1)         # max over neighbors (sublane reduce)


def mlp_max_pool(grouped, weights, biases, *, tile_s_target=128,
                 vmem_limit_bytes=48 * 1024 * 1024):
    """grouped: (B, S, K, Cin) bf16 -> (B, S, C_out) f32."""
    B, S, K, Cin = grouped.shape
    C_out = weights[-1].shape[1]
    C_pad = _round_up(C_out, 128)           # lane-dense output stores

    ws = [w.astype(jnp.bfloat16) for w in weights]
    bs = [b.astype(jnp.float32) for b in biases]
    if C_pad != C_out:
        ws[-1] = jnp.pad(ws[-1], ((0, 0), (0, C_pad - C_out)))
        bs[-1] = jnp.pad(bs[-1], ((0, 0), (0, C_pad - C_out)))

    tile_s = _pick_tile(S, tile_s_target, 8)   # sized so 2x(tile_s*K*Cin*2B)+weights << 48 MiB

    in_specs = [pl.BlockSpec((1, tile_s, K, Cin), lambda b, s: (b, s, 0, 0))]
    wb_args = []
    for w, bv in zip(ws, bs):
        in_specs.append(pl.BlockSpec(w.shape, lambda b, s: (0, 0)))   # resident
        in_specs.append(pl.BlockSpec(bv.shape, lambda b, s: (0, 0)))  # resident
        wb_args += [w, bv]

    out = pl.pallas_call(
        _mlp_max_kernel,
        out_shape=jax.ShapeDtypeStruct((B, S, C_pad), jnp.float32),
        grid=(B, S // tile_s),
        in_specs=in_specs,
        out_specs=pl.BlockSpec((1, tile_s, C_pad), lambda b, s: (b, s, 0)),
        compiler_params=pltpu.CompilerParams(
            dimension_semantics=("parallel", "parallel"),
            vmem_limit_bytes=vmem_limit_bytes),
    )(grouped, *wb_args)
    return out[..., :C_out]


# ----------------------------------------------------------------------------
# Glue (plain JAX): gather; reference-only FPS
# ----------------------------------------------------------------------------
def index_points(points, idx):
    """points: (B, N, C); idx: (B, ...) of int indices into axis 1."""
    B = points.shape[0]
    idx_flat = idx.reshape(B, -1)
    out = jnp.take_along_axis(points, idx_flat[..., None], axis=1)
    return out.reshape(idx.shape + (points.shape[-1],))


def farthest_point_sample_ref(xyz, npoint):
    """Pure-JAX FPS (reference only)."""
    B, N, _ = xyz.shape

    def body(i, state):
        centroids, distance, farthest = state
        centroids = centroids.at[:, i].set(farthest)
        centroid = jnp.take_along_axis(xyz, farthest[:, None, None], axis=1)  # (B,1,3)
        dist = jnp.sum((xyz - centroid) ** 2, axis=-1)                         # (B,N)
        distance = jnp.minimum(distance, dist)
        farthest = jnp.argmax(distance, axis=-1).astype(jnp.int32)
        return centroids, distance, farthest

    centroids = jnp.zeros((B, npoint), dtype=jnp.int32)
    distance = jnp.full((B, N), 1e10, dtype=xyz.dtype)
    farthest = jnp.zeros((B,), dtype=jnp.int32)
    centroids, _, _ = jax.lax.fori_loop(0, npoint, body, (centroids, distance, farthest))
    return centroids


# ----------------------------------------------------------------------------
# TransitionDown forward
# ----------------------------------------------------------------------------
def transition_down(xyz, points, params, npoint, nsample):
    """xyz: (B, N, 3), points: (B, N, D) -> (new_xyz (B,S,3), new_points (B,S,C_last))."""
    weights, biases = params

    # lane-friendly coordinate layouts: coord axis zero-padded 3 -> 8
    xyz_pad = jnp.pad(xyz, ((0, 0), (0, 0), (0, 5)))                 # (B, N, 8)
    xyz_t = jnp.transpose(xyz_pad, (0, 2, 1))                        # (B, 8, N) lane-dense

    # farthest point sampling                                        -- Pallas
    new_xyz_t = farthest_point_sample_coords_t(xyz_t, npoint)        # (B, 8, S)
    new_xyz_pad = jnp.transpose(new_xyz_t, (0, 2, 1))                # (B, S, 8) (tiny XLA op)
    new_xyz = new_xyz_pad[..., :3]                                   # (B, S, 3)

    # kNN: tiled negated pairwise sqdist (Pallas) + top_k (no full argsort, no extra negate)
    neg_dists = pairwise_neg_sqdist(new_xyz_pad, xyz_t)              # (B, S, N) -- Pallas
    _, knn_idx = jax.lax.top_k(neg_dists, nsample)                   # (B, S, K)

    # grouping (XLA gather; see TODO about fusing into the MLP kernel)
    grouped_xyz = index_points(xyz, knn_idx)                         # (B, S, K, 3)
    grouped_xyz_norm = grouped_xyz - new_xyz[:, :, None, :]
    grouped_points = index_points(points, knn_idx)                   # (B, S, K, D)
    new_points = jnp.concatenate([grouped_xyz_norm, grouped_points], axis=-1)
    # cast fuses into the gather/concat fusion; halves the MLP kernel's HBM input and is
    # numerically identical to the previous in-kernel bf16 cast at the MXU boundary
    new_points = new_points.astype(jnp.bfloat16)

    # shared MLP + max over neighbors                                -- Pallas
    pooled = mlp_max_pool(new_points, weights, biases)               # (B, S, C_last)
    return new_xyz, pooled


# ----------------------------------------------------------------------------
# Deterministic parameter construction (Conv2d 1x1 + BatchNorm2d(eval), folded)
# ----------------------------------------------------------------------------
def make_params(key, channels):
    weights, biases = [], []
    eps = 1e-5
    last = channels[0]
    for c_out in channels[1:]:
        key, k1, k2, k3, k4 = jax.random.split(key, 5)
        w = 0.1 * jax.random.normal(k1, (last, c_out), jnp.float32)   # conv weight^T (Cin,Cout)
        b = 0.1 * jax.random.normal(k2, (c_out,), jnp.float32)        # conv bias
        gamma = 1.0 + 0.1 * jax.random.normal(k3, (c_out,), jnp.float32)
        beta = 0.1 * jax.random.normal(k4, (c_out,), jnp.float32)
        run_mean = jnp.zeros((c_out,), jnp.float32)
        run_var = jnp.ones((c_out,), jnp.float32)
        scale = gamma / jnp.sqrt(run_var + eps)
        w_fold = w * scale[None, :]
        b_fold = ((b - run_mean) * scale + beta)[None, :]             # (1, Cout)
        weights.append(w_fold)
        biases.append(b_fold)
        last = c_out
    return weights, biases


# ----------------------------------------------------------------------------
# Pure-JAX reference (mirrors the bf16-at-the-MXU-boundary math of the kernels)
# ----------------------------------------------------------------------------
def _reference(xyz, points, params, npoint, nsample):
    weights, biases = params
    fps_idx = farthest_point_sample_ref(xyz, npoint)
    new_xyz = index_points(xyz, fps_idx)
    dists = (jnp.sum(new_xyz ** 2, -1)[:, :, None]
             - 2.0 * jnp.einsum("bsc,bnc->bsn", new_xyz, xyz,
                                precision=jax.lax.Precision.HIGHEST)
             + jnp.sum(xyz ** 2, -1)[:, None, :])
    knn_idx = jnp.argsort(dists, axis=-1)[:, :, :nsample]
    grouped_xyz = index_points(xyz, knn_idx) - new_xyz[:, :, None, :]
    grouped_points = index_points(points, knn_idx)
    h = jnp.concatenate([grouped_xyz, grouped_points], axis=-1)
    for w, b in zip(weights, biases):
        y = jnp.einsum("bskc,cd->bskd", h.astype(jnp.bfloat16), w.astype(jnp.bfloat16),
                       preferred_element_type=jnp.float32)
        h = jnp.maximum(y + b[None, None], 0.0)
    return new_xyz, jnp.max(h, axis=2)


if __name__ == "__main__":
    B, N, D = 2, 16, 3
    npoint, nneighbor = 8, 8                # nneighbor kept a multiple of 8 (sublane-aligned)
    channels = [D + 3, 32, 64]              # in_channel = D + 3 (xyz-offsets ++ features)

    key = jax.random.PRNGKey(0)
    k_xyz, k_pts, k_par = jax.random.split(key, 3)
    xyz = jax.random.normal(k_xyz, (B, N, 3), jnp.float32)
    points = jax.random.normal(k_pts, (B, N, D), jnp.float32)
    params = make_params(k_par, channels)

    fwd = jax.jit(functools.partial(transition_down, npoint=npoint, nsample=nneighbor))
    new_xyz, new_points = fwd(xyz, points, params)
    jax.block_until_ready((new_xyz, new_points))

    ref_xyz, ref_points = _reference(xyz, points, params, npoint, nneighbor)
    assert new_xyz.shape == (B, npoint, 3) and new_points.shape == (B, npoint, channels[-1])
    assert jnp.allclose(new_xyz, ref_xyz, atol=1e-5)
    assert jnp.allclose(new_points, ref_points, atol=1e-3, rtol=1e-3)

    print("KERNEL_OK")
</pallas_src>

<mosaic_0001>
module attributes {stable_mosaic.version = 11 : i64} {
  func.func @_fps_kernel(%arg0: i32, %arg1: memref<1x8x16xf32, #tpu.memory_space<vmem>>, %arg2: memref<1x8x8xf32, #tpu.memory_space<vmem>>, %arg3: memref<1x16xf32, #tpu.memory_space<vmem>>) attributes {dimension_semantics = [#tpu.dimension_semantics<parallel>], iteration_bounds = array<i64: 2>, scalar_prefetch = 0 : i64, scratch_operands = 1 : i64, tpu.core_type = #tpu.core_type<tc>, window_params = [{transform_indices = @transform_0, window_bounds = array<i64: 1, 8, 16>}, {transform_indices = @transform_1, window_bounds = array<i64: 1, 8, 8>}]} {
    %0 = tpu.iota {dimensions = array<i32: 1>} : vector<1x16xi32>
    %1 = tpu.iota {dimensions = array<i32: 1>} : vector<1x8xi32>
    %cst = arith.constant 1.000000e+10 : f32
    %2 = vector.broadcast %cst : f32 to vector<1x16xf32>
    %c0 = arith.constant 0 : index
    %c0_0 = arith.constant 0 : index
    %3 = vector.load %arg3[%c0, %c0_0] : memref<1x16xf32, #tpu.memory_space<vmem>>, vector<1x16xf32>
    tpu.vector_store %arg3[%c0, %c0_0], %2 {strides = array<i32>} : memref<1x16xf32, #tpu.memory_space<vmem>>, vector<1x16xf32>,
    %cst_1 = arith.constant 0.000000e+00 : f32
    %4 = vector.broadcast %cst_1 : f32 to vector<8x8xf32>
    %c0_2 = arith.constant 0 : index
    %c0_3 = arith.constant 0 : index
    %c0_4 = arith.constant 0 : index
    %5 = vector.load %arg2[%c0_2, %c0_3, %c0_4] : memref<1x8x8xf32, #tpu.memory_space<vmem>>, vector<1x8x8xf32>
    %6 = vector.shape_cast %5 : vector<1x8x8xf32> to vector<8x8xf32>
    %7 = vector.shape_cast %4 : vector<8x8xf32> to vector<1x8x8xf32>
    tpu.vector_store %arg2[%c0_2, %c0_3, %c0_4], %7 {strides = array<i32>} : memref<1x8x8xf32, #tpu.memory_space<vmem>>, vector<1x8x8xf32>,
    %c0_i32 = arith.constant 0 : i32
    %8 = vector.broadcast %c0_i32 : i32 to vector<1x1xi32>
    %c0_i32_5 = arith.constant 0 : i32
    %c8_i32 = arith.constant 8 : i32
    %9 = arith.addi %c0_i32_5, %c8_i32 : i32
    %c1_i32 = arith.constant 1 : i32
    %10 = scf.for %arg4 = %c0_i32_5 to %9 step %c1_i32 iter_args(%arg5 = %8) -> (vector<1x1xi32>)  : i32 {
      %c0_7 = arith.constant 0 : index
      %c0_8 = arith.constant 0 : index
      %c0_9 = arith.constant 0 : index
      %11 = vector.load %arg1[%c0_7, %c0_8, %c0_9] : memref<1x8x16xf32, #tpu.memory_space<vmem>>, vector<1x8x16xf32>
      %12 = vector.shape_cast %11 : vector<1x8x16xf32> to vector<8x16xf32>
      %13 = vector.broadcast %arg5 : vector<1x1xi32> to vector<1x16xi32>
      %14 = arith.cmpi eq, %0, %13 : vector<1x16xi32>
      %cst_10 = arith.constant 0.000000e+00 : f32
      %15 = vector.shape_cast %14 : vector<1x16xi1> to vector<1x16xi1>
      %16 = vector.broadcast %15 : vector<1x16xi1> to vector<8x16xi1>
      %17 = vector.broadcast %cst_10 : f32 to vector<8x16xf32>
      %18 = arith.select %16, %12, %17 : vector<8x16xi1>, vector<8x16xf32>
      %cst_11 = arith.constant dense<0.000000e+00> : vector<8xf32>
      %19 = vector.multi_reduction <add>, %18, %cst_11 [1] : vector<8x16xf32> to vector<8xf32>
      %20 = vector.shape_cast %19 : vector<8xf32> to vector<8x1xf32>
      %21 = vector.broadcast %arg4 : i32 to vector<1x8xi32>
      %22 = arith.cmpi eq, %1, %21 : vector<1x8xi32>
      %c0_12 = arith.constant 0 : index
      %c0_13 = arith.constant 0 : index
      %c0_14 = arith.constant 0 : index
      %23 = vector.load %arg2[%c0_12, %c0_13, %c0_14] : memref<1x8x8xf32, #tpu.memory_space<vmem>>, vector<1x8x8xf32>
      %24 = vector.shape_cast %23 : vector<1x8x8xf32> to vector<8x8xf32>
      %25 = vector.shape_cast %22 : vector<1x8xi1> to vector<1x8xi1>
      %26 = vector.broadcast %25 : vector<1x8xi1> to vector<8x8xi1>
      %27 = vector.shape_cast %20 : vector<8x1xf32> to vector<8x1xf32>
      %28 = vector.broadcast %27 : vector<8x1xf32> to vector<8x8xf32>
      %29 = arith.select %26, %28, %24 : vector<8x8xi1>, vector<8x8xf32>
      %c0_15 = arith.constant 0 : index
      %c0_16 = arith.constant 0 : index
      %c0_17 = arith.constant 0 : index
      %30 = vector.load %arg2[%c0_15, %c0_16, %c0_17] : memref<1x8x8xf32, #tpu.memory_space<vmem>>, vector<1x8x8xf32>
      %31 = vector.shape_cast %30 : vector<1x8x8xf32> to vector<8x8xf32>
      %32 = vector.shape_cast %29 : vector<8x8xf32> to vector<1x8x8xf32>
      tpu.vector_store %arg2[%c0_15, %c0_16, %c0_17], %32 {strides = array<i32>} : memref<1x8x8xf32, #tpu.memory_space<vmem>>, vector<1x8x8xf32>,
      %33 = vector.broadcast %20 : vector<8x1xf32> to vector<8x16xf32>
      %34 = arith.subf %12, %33 : vector<8x16xf32>
      %35 = arith.mulf %34, %34 : vector<8x16xf32>
      %cst_18 = arith.constant dense<0.000000e+00> : vector<16xf32>
      %36 = vector.multi_reduction <add>, %35, %cst_18 [0] : vector<8x16xf32> to vector<16xf32>
      %37 = vector.shape_cast %36 : vector<16xf32> to vector<1x16xf32>
      %c0_19 = arith.constant 0 : index
      %c0_20 = arith.constant 0 : index
      %38 = vector.load %arg3[%c0_19, %c0_20] : memref<1x16xf32, #tpu.memory_space<vmem>>, vector<1x16xf32>
      %39 = arith.minimumf %38, %37 : vector<1x16xf32>
      %c0_21 = arith.constant 0 : index
      %c0_22 = arith.constant 0 : index
      %40 = vector.load %arg3[%c0_21, %c0_22] : memref<1x16xf32, #tpu.memory_space<vmem>>, vector<1x16xf32>
      tpu.vector_store %arg3[%c0_21, %c0_22], %39 {strides = array<i32>} : memref<1x16xf32, #tpu.memory_space<vmem>>, vector<1x16xf32>,
      %cst_23 = arith.constant dense<0xFF800000> : vector<1xf32>
      %41 = vector.multi_reduction <maximumf>, %39, %cst_23 [1] : vector<1x16xf32> to vector<1xf32>
      %42 = vector.shape_cast %41 : vector<1xf32> to vector<1x1xf32>
      %43 = vector.broadcast %42 : vector<1x1xf32> to vector<1x16xf32>
      %44 = arith.cmpf oeq, %39, %43 : vector<1x16xf32>
      %c16_i32 = arith.constant 16 : i32
      %45 = vector.broadcast %c16_i32 : i32 to vector<1x16xi32>
      %46 = arith.select %44, %0, %45 : vector<1x16xi1>, vector<1x16xi32>
      %cst_24 = arith.constant dense<2147483647> : vector<1xi32>
      %47 = vector.multi_reduction <minsi>, %46, %cst_24 [1] : vector<1x16xi32> to vector<1xi32>
      %48 = vector.shape_cast %47 : vector<1xi32> to vector<1x1xi32>
      scf.yield %48 : vector<1x1xi32>
    }
    %c8_i32_6 = arith.constant 8 : i32
    return
  }
  func.func @transform_0(%arg0: i32) -> (i32, i32, i32) {
    %c0_i32 = arith.constant 0 : i32
    %c0_i32_0 = arith.constant 0 : i32
    %c0_i32_1 = arith.constant 0 : i32
    return %arg0, %c0_i32, %c0_i32_0 : i32, i32, i32
  }
  func.func @transform_1(%arg0: i32) -> (i32, i32, i32) {
    %c0_i32 = arith.constant 0 : i32
    %c0_i32_0 = arith.constant 0 : i32
    %c0_i32_1 = arith.constant 0 : i32
    return %arg0, %c0_i32, %c0_i32_0 : i32, i32, i32
  }
}

module attributes {stable_mosaic.version = 11 : i64} {
  func.func @_neg_sqdist_kernel(%arg0: i32, %arg1: i32, %arg2: i32, %arg3: memref<1x8x8xf32, #tpu.memory_space<vmem>>, %arg4: memref<1x8x16xf32, #tpu.memory_space<vmem>>, %arg5: memref<1x8x16xf32, #tpu.memory_space<vmem>>) attributes {dimension_semantics = [#tpu.dimension_semantics<parallel>, #tpu.dimension_semantics<parallel>, #tpu.dimension_semantics<parallel>], iteration_bounds = array<i64: 2, 1, 1>, scalar_prefetch = 0 : i64, scratch_operands = 0 : i64, tpu.core_type = #tpu.core_type<tc>, window_params = [{transform_indices = @transform_0, window_bounds = array<i64: 1, 8, 8>}, {transform_indices = @transform_1, window_bounds = array<i64: 1, 8, 16>}, {transform_indices = @transform_2, window_bounds = array<i64: 1, 8, 16>}]} {
    %c0 = arith.constant 0 : index
    %c0_0 = arith.constant 0 : index
    %c0_1 = arith.constant 0 : index
    %0 = vector.load %arg3[%c0, %c0_0, %c0_1] : memref<1x8x8xf32, #tpu.memory_space<vmem>>, vector<1x8x8xf32>
    %1 = vector.shape_cast %0 : vector<1x8x8xf32> to vector<8x8xf32>
    %c0_2 = arith.constant 0 : index
    %c0_3 = arith.constant 0 : index
    %c0_4 = arith.constant 0 : index
    %2 = vector.load %arg4[%c0_2, %c0_3, %c0_4] : memref<1x8x16xf32, #tpu.memory_space<vmem>>, vector<1x8x16xf32>
    %3 = vector.shape_cast %2 : vector<1x8x16xf32> to vector<8x16xf32>
    %cst = arith.constant dense<0.000000e+00> : vector<8x16xf32>
    %4 = tpu.matmul %1, %3, %cst {dimension_numbers = #tpu.dot_dimension_numbers<[1], [0], [0], [1], [0, 0, 1, 1], [], []>} : vector<8x8xf32>, vector<8x16xf32>, vector<8x16xf32> -> vector<8x16xf32>
    %5 = arith.mulf %1, %1 : vector<8x8xf32>
    %cst_5 = arith.constant dense<0.000000e+00> : vector<8xf32>
    %6 = vector.multi_reduction <add>, %5, %cst_5 [1] : vector<8x8xf32> to vector<8xf32>
    %7 = vector.shape_cast %6 : vector<8xf32> to vector<8x1xf32>
    %8 = arith.mulf %3, %3 : vector<8x16xf32>
    %cst_6 = arith.constant dense<0.000000e+00> : vector<16xf32>
    %9 = vector.multi_reduction <add>, %8, %cst_6 [0] : vector<8x16xf32> to vector<16xf32>
    %10 = vector.shape_cast %9 : vector<16xf32> to vector<1x16xf32>
    %cst_7 = arith.constant 2.000000e+00 : f32
    %11 = vector.broadcast %cst_7 : f32 to vector<8x16xf32>
    %12 = arith.mulf %11, %4 : vector<8x16xf32>
    %13 = vector.broadcast %7 : vector<8x1xf32> to vector<8x16xf32>
    %14 = arith.subf %13, %12 : vector<8x16xf32>
    %15 = vector.broadcast %10 : vector<1x16xf32> to vector<8x16xf32>
    %16 = arith.addf %14, %15 : vector<8x16xf32>
    %cst_8 = arith.constant 0.000000e+00 : f32
    %17 = vector.broadcast %cst_8 : f32 to vector<8x16xf32>
    %18 = arith.subf %17, %16 : vector<8x16xf32>
    %c0_9 = arith.constant 0 : index
    %c0_10 = arith.constant 0 : index
    %c0_11 = arith.constant 0 : index
    %19 = vector.load %arg5[%c0_9, %c0_10, %c0_11] : memref<1x8x16xf32, #tpu.memory_space<vmem>>, vector<1x8x16xf32>
    %20 = vector.shape_cast %19 : vector<1x8x16xf32> to vector<8x16xf32>
    %21 = vector.shape_cast %18 : vector<8x16xf32> to vector<1x8x16xf32>
    tpu.vector_store %arg5[%c0_9, %c0_10, %c0_11], %21 {strides = array<i32>} : memref<1x8x16xf32, #tpu.memory_space<vmem>>, vector<1x8x16xf32>,
    return
  }
  func.func @transform_0(%arg0: i32, %arg1: i32, %arg2: i32) -> (i32, i32, i32) {
    %c0_i32 = arith.constant 0 : i32
    %c0_i32_0 = arith.constant 0 : i32
    return %arg0, %arg1, %c0_i32 : i32, i32, i32
  }
  func.func @transform_1(%arg0: i32, %arg1: i32, %arg2: i32) -> (i32, i32, i32) {
    %c0_i32 = arith.constant 0 : i32
    %c0_i32_0 = arith.constant 0 : i32
    return %arg0, %c0_i32, %arg2 : i32, i32, i32
  }
  func.func @transform_2(%arg0: i32, %arg1: i32, %arg2: i32) -> (i32, i32, i32) {
    %c0_i32 = arith.constant 0 : i32
    return %arg0, %arg1, %arg2 : i32, i32, i32
  }
}

module attributes {stable_mosaic.version = 11 : i64} {
  func.func @_mlp_max_kernel(%arg0: i32, %arg1: i32, %arg2: memref<1x8x8x6xbf16, #tpu.memory_space<vmem>>, %arg3: memref<6x32xbf16, #tpu.memory_space<vmem>>, %arg4: memref<1x32xf32, #tpu.memory_space<vmem>>, %arg5: memref<32x128xbf16, #tpu.memory_space<vmem>>, %arg6: memref<1x128xf32, #tpu.memory_space<vmem>>, %arg7: memref<1x8x128xf32, #tpu.memory_space<vmem>>) attributes {dimension_semantics = [#tpu.dimension_semantics<parallel>, #tpu.dimension_semantics<parallel>], iteration_bounds = array<i64: 2, 1>, scalar_prefetch = 0 : i64, scratch_operands = 0 : i64, tpu.core_type = #tpu.core_type<tc>, window_params = [{transform_indices = @transform_0, window_bounds = array<i64: 1, 8, 8, 6>}, {pipeline_mode = #tpu.pipeline_mode<synchronous>, transform_indices = @transform_1, window_bounds = array<i64: 6, 32>}, {pipeline_mode = #tpu.pipeline_mode<synchronous>, transform_indices = @transform_2, window_bounds = array<i64: 1, 32>}, {pipeline_mode = #tpu.pipeline_mode<synchronous>, transform_indices = @transform_3, window_bounds = array<i64: 32, 128>}, {pipeline_mode = #tpu.pipeline_mode<synchronous>, transform_indices = @transform_4, window_bounds = array<i64: 1, 128>}, {transform_indices = @transform_5, window_bounds = array<i64: 1, 8, 128>}]} {
    %c0 = arith.constant 0 : index
    %c0_0 = arith.constant 0 : index
    %c0_1 = arith.constant 0 : index
    %c0_2 = arith.constant 0 : index
    %0 = vector.load %arg2[%c0, %c0_0, %c0_1, %c0_2] : memref<1x8x8x6xbf16, #tpu.memory_space<vmem>>, vector<1x8x8x6xbf16>
    %1 = vector.shape_cast %0 : vector<1x8x8x6xbf16> to vector<8x8x6xbf16>
    %2 = vector.shape_cast %1 : vector<8x8x6xbf16> to vector<64x6xbf16>
    %c0_3 = arith.constant 0 : index
    %c0_4 = arith.constant 0 : index
    %3 = vector.load %arg3[%c0_3, %c0_4] : memref<6x32xbf16, #tpu.memory_space<vmem>>, vector<6x32xbf16>
    %c0_5 = arith.constant 0 : index
    %c0_6 = arith.constant 0 : index
    %4 = vector.load %arg4[%c0_5, %c0_6] : memref<1x32xf32, #tpu.memory_space<vmem>>, vector<1x32xf32>
    %cst = arith.constant dense<0.000000e+00> : vector<64x32xf32>
    %5 = tpu.matmul %2, %3, %cst {dimension_numbers = #tpu.dot_dimension_numbers<[1], [0], [0], [1], [0, 0, 1, 1], [], []>} : vector<64x6xbf16>, vector<6x32xbf16>, vector<64x32xf32> -> vector<64x32xf32>
    %6 = vector.broadcast %4 : vector<1x32xf32> to vector<64x32xf32>
    %7 = arith.addf %5, %6 : vector<64x32xf32>
    %cst_7 = arith.constant 0.000000e+00 : f32
    %8 = vector.broadcast %cst_7 : f32 to vector<64x32xf32>
    %9 = arith.maximumf %7, %8 : vector<64x32xf32>
    %c0_8 = arith.constant 0 : index
    %c0_9 = arith.constant 0 : index
    %10 = vector.load %arg5[%c0_8, %c0_9] : memref<32x128xbf16, #tpu.memory_space<vmem>>, vector<32x128xbf16>
    %c0_10 = arith.constant 0 : index
    %c0_11 = arith.constant 0 : index
    %11 = vector.load %arg6[%c0_10, %c0_11] : memref<1x128xf32, #tpu.memory_space<vmem>>, vector<1x128xf32>
    %12 = arith.truncf %9 : vector<64x32xf32> to vector<64x32xbf16>
    %cst_12 = arith.constant dense<0.000000e+00> : vector<64x128xf32>
    %13 = tpu.matmul %12, %10, %cst_12 {dimension_numbers = #tpu.dot_dimension_numbers<[1], [0], [0], [1], [0, 0, 1, 1], [], []>} : vector<64x32xbf16>, vector<32x128xbf16>, vector<64x128xf32> -> vector<64x128xf32>
    %14 = vector.broadcast %11 : vector<1x128xf32> to vector<64x128xf32>
    %15 = arith.addf %13, %14 : vector<64x128xf32>
    %cst_13 = arith.constant 0.000000e+00 : f32
    %16 = vector.broadcast %cst_13 : f32 to vector<64x128xf32>
    %17 = arith.maximumf %15, %16 : vector<64x128xf32>
    %18 = vector.shape_cast %17 : vector<64x128xf32> to vector<8x8x128xf32>
    %cst_14 = arith.constant dense<0xFF800000> : vector<8x128xf32>
    %19 = vector.multi_reduction <maximumf>, %18, %cst_14 [1] : vector<8x8x128xf32> to vector<8x128xf32>
    %c0_15 = arith.constant 0 : index
    %c0_16 = arith.constant 0 : index
    %c0_17 = arith.constant 0 : index
    %20 = vector.load %arg7[%c0_15, %c0_16, %c0_17] : memref<1x8x128xf32, #tpu.memory_space<vmem>>, vector<1x8x128xf32>
    %21 = vector.shape_cast %20 : vector<1x8x128xf32> to vector<8x128xf32>
    %22 = vector.shape_cast %19 : vector<8x128xf32> to vector<1x8x128xf32>
    tpu.vector_store %arg7[%c0_15, %c0_16, %c0_17], %22 {strides = array<i32>} : memref<1x8x128xf32, #tpu.memory_space<vmem>>, vector<1x8x128xf32>,
    return
  }
  func.func @transform_0(%arg0: i32, %arg1: i32) -> (i32, i32, i32, i32) {
    %c0_i32 = arith.constant 0 : i32
    %c0_i32_0 = arith.constant 0 : i32
    %c0_i32_1 = arith.constant 0 : i32
    return %arg0, %arg1, %c0_i32, %c0_i32_0 : i32, i32, i32, i32
  }
  func.func @transform_1(%arg0: i32, %arg1: i32) -> (i32, i32) {
    %c0_i32 = arith.constant 0 : i32
    %c0_i32_0 = arith.constant 0 : i32
    %c0_i32_1 = arith.constant 0 : i32
    return %c0_i32, %c0_i32_0 : i32, i32
  }
  func.func @transform_2(%arg0: i32, %arg1: i32) -> (i32, i32) {
    %c0_i32 = arith.constant 0 : i32
    %c0_i32_0 = arith.constant 0 : i32
    %c0_i32_1 = arith.constant 0 : i32
    return %c0_i32, %c0_i32_0 : i32, i32
  }
  func.func @transform_3(%arg0: i32, %arg1: i32) -> (i32, i32) {
    %c0_i32 = arith.constant 0 : i32
    %c0_i32_0 = arith.constant 0 : i32
    %c0_i32_1 = arith.constant 0 : i32
    return %c0_i32, %c0_i32_0 : i32, i32
  }
  func.func @transform_4(%arg0: i32, %arg1: i32) -> (i32, i32) {
    %c0_i32 = arith.constant 0 : i32
    %c0_i32_0 = arith.constant 0 : i32
    %c0_i32_1 = arith.constant 0 : i32
    return %c0_i32, %c0_i32_0 : i32, i32
  }
  func.func @transform_5(%arg0: i32, %arg1: i32) -> (i32, i32, i32) {
    %c0_i32 = arith.constant 0 : i32
    %c0_i32_0 = arith.constant 0 : i32
    return %arg0, %arg1, %c0_i32 : i32, i32, i32
  }
}

</mosaic_0001>

<bundles_post_ra>
// kernel: transition_down.3
= control target key start
LH: loop header
LB: loop body
LE: loop exit
PB: predicated region body
PF: predicated region fallthrough
CT: control target
= control target key end

     0   :  { %s311_s6 = smov 0   ;;  %s358_s0 = inlined_call_operand.vmem [shape: f32[2,8,16], index: 0, kind: input, shape index: {}]   ;;  %s359_s1 = inlined_call_operand.vmem [shape: f32[2,8,8], index: 1, kind: output, shape index: {}]  }
   0x1 LB: > { %s238_s7 = sadd.s32 4294967295, %s288_s6   ;;  %p242_p0 = scmp.ge.s32.totalorder %s288_s6, 1  ;;  %s288_s6 = sphi %s311_s6, %s11_s6  }
   0x2   : > { %p86_p1 = scmp.lt.s32.totalorder %s288_s6, 3 }
   0x4   : > { %p87_p2 = pnand %p242_p0, %p86_p1 }
   0x5   : > { %v112_v0 = vlaneseq (!%p87_p2)  ;;  %vm114_vm0 = vcmask (!%p87_p2), 122880   ;;  %p104_p3 = scmp.lt.s32.totalorder (!%p87_p2), %s238_s7, 1  ;;  %v298_v1 = vmov (!%p87_p2), 1e+10   ;;  %vm116_vm1 = vcmask (!%p87_p2), 64512   ;;  %s335_s15 = smov (!%p87_p2), 0  }
   0x6   : > { %90 = sbr.rel (%p87_p2) target bundleno = 626 (0x272), region = 24  ;;  %115 = vst.msk [vmem:[#allocation2] sm:$0x1] (!%p87_p2), %vm114_vm0, %v298_v1  ;;  %v299_v3 = vmov (!%p87_p2), 0.0   ;;  %v290_v4 = vmov (!%p87_p2), 0  }
   0x7   : > { %v321_v2 = vand.u32 (!%p87_p2), 127, %v112_v0 }
   0xd   : > { %s361_s7 = smov (!%p104_p3, %s238_s7), 1 }
   0xe   : > { %s243_s8 = sshll.u32 %s361_s7, 3 }
   0xf   : > { %s326_s11 = scalar_lea.vmem %s358_s0, %s243_s8  ;;  %s331_s14 = scalar_lea.vmem %s359_s1, %s243_s8 }
  0x10   : > { %117 = vst.msk [vmem:[%s331_s14] sm:$0xff] %vm116_vm1, %v299_v3 }
  0x11 LB: >> { %v129_v5 = vshrl.u32 %v112_v0, 7  ;;  %vm126_vm2 = vcmp.eq.s32.totalorder %v321_v2, %v292_v4  ;;  %v300_v7 = vmov 0   ;;  %v125_v9 = vld [vmem:[%s326_s11] sm:$0xff]  ;;  %vm134_vm3 = vcmask 130048   ;;  %s296_s15 = sphi %s335_s15, %s123_s15   ;;  %v292_v4 = vphi %v290_v4, %v176_v4  }
  0x12   : >> { %v127_v8 = vsel %vm126_vm2, 1, %v300_v7  ;;  %v138_v13 = vstv %s296_s15  ;;  %v154_v25 = vld [vmem:[#allocation2] sm:$0x1]  ;;  %s123_s15 = sadd.s32 1, %s296_s15  }
  0x13   : >> { %v130_v6 = vsub.s32 0, %v129_v5  ;;  %vm139_vm5 = vcmp.eq.s32.totalorder %v321_v2, %v138_v13  ;;  %p120_p4 = scmp.ge.s32.totalorder %s123_s15, 8  }
  0x15   : >> { %v131_v10 = vrot.slane %v127_v8, %v130_v6 }
  0x17   : >> { %vm132_vm4 = vcmp.eq.s32.totalorder %v131_v10, 1  ;;  %v140_v14 = vld [vmem:[%s331_s14] sm:$0xff] }
  0x18   : >> { %v133_v11 = vsel %vm132_vm4, %v125_v9, 0.0 }
  0x19   : >> { %v135_v12 = vsel %vm134_vm3, %v133_v11, 0.0 }
  0x1a   : >> { %136 = vadd.xlane.f32.xlu0 %v135_v12 }
  0xa7   : >> { %v137_v15 = vpop.xlane.xlu0 %136 }
  0xa8   : >> { %v143_v16 = vsel %vm139_vm5, %v137_v15, %v140_v14  ;;  %v145_v17 = vsub.f32 %v125_v9, %v137_v15 }
  0xa9   : >> { %144 = vst.msk [vmem:[%s331_s14] sm:$0xff] %vm116_vm1, %v143_v16 }
  0xaa   : >> { %v146_v18 = vmul.f32 %v145_v17, %v145_v17 }
  0xac   : >> { %v147_v19 = vsel %vm134_vm3, %v146_v18, 0.0 }
  0xad   : >> { %v148_v20 = vrot.slane %v147_v19, 4 }
  0xaf   : >> { %v149_v21 = vadd.f32 %v148_v20, %v147_v19 }
  0xb1   : >> { %v150_v22 = vrot.slane %v149_v21, 2 }
  0xb3   : >> { %v151_v23 = vadd.f32 %v150_v22, %v149_v21 }
  0xb5   : >> { %v152_v24 = vrot.slane %v151_v23, 1 }
  0xb7   : >> { %v153_v26 = vadd.f32 %v152_v24, %v151_v23 }
  0xb9   : >> { %v155_v27 = vmin.f32 %v154_v25, %v153_v26 }
  0xbb   : >> { %v157_v28 = vsel %vm114_vm0, %v155_v27, -inf  ;;  %156 = vst.msk [vmem:[#allocation2] sm:$0x1] %vm114_vm0, %v155_v27 }
  0xbc   : >> { %158 = vmax.xlane.f32.xlu0 %v157_v28 }
 0x149   : >> { %v159_v29 = vpop.xlane.xlu0 %158 }
 0x14a   : >> { %vm160_vm6 = vcmp.eq.f32.partialorder %v155_v27, %v159_v29 }
 0x14b   : >> { %v161_v30 = vsel %vm160_vm6, %v321_v2, 16 }
 0x14c   : >> { %v162_v31 = vsel %vm114_vm0, %v161_v30, 2147483647 }
 0x14d   : >> { %v164_v32 = vshra.s32 %v162_v31, 16  ;;  %v163_v34 = vand.u32 65535, %v162_v31 }
 0x14f   : >> { %v166_v33 = vcvt.s32.f32 %v164_v32  ;;  %v165_v36 = vcvt.s32.f32 %v163_v34 }
 0x151   : >> { %167 = vmin.xlane.f32.xlu1 %v166_v33 }
 0x1de   : >> { %v168_v35 = vpop.xlane.xlu1 %167 }
 0x1df   : >> { %vm169_vm7 = vcmp.eq.f32.partialorder %v166_v33, %v168_v35  ;;  %v174_v38 = vcvt.f32.s32 %v168_v35 }
 0x1e0   : >> { %v170_v37 = vsel %vm169_vm7, %v165_v36, inf }
 0x1e1   : >> { %171 = vmin.xlane.f32.xlu1 %v170_v37  ;;  %v175_v40 = vshll.u32 %v174_v38, 16 }
 0x26b   : > { %122 = sbr.rel (!%p120_p4) target bundleno = 17 (0x11), region = 61 }
 0x26e   : >> { %v172_v39 = vpop.xlane.xlu1 %171 }
 0x26f   : >> { %v173_v41 = vcvt.f32.s32 %v172_v39 }
 0x271   : >> { %v176_v4 = vadd.s32 %v175_v40, %v173_v41  }
 0x272 PF: > { %s11_s6 = sadd.s32 1, %s288_s6  }
 0x273   : > { %p8_p5 = scmp.ge.s32.totalorder %s11_s6, 4  }
 0x275   :  { %10 = sbr.rel (!%p8_p5) target bundleno = 1 (0x1), region = 72 }

// kernel: transition_down.4
= control target key start
LH: loop header
LB: loop body
LE: loop exit
PB: predicated region body
PF: predicated region fallthrough
CT: control target
= control target key end

     0   :  { %s494_s9 = smov 0   ;;  %s496_s10 = smov 0   ;;  %s532_s0 = inlined_call_operand.vmem [shape: f32[2,8,8], index: 0, kind: input, shape index: {}]   ;;  %s533_s1 = inlined_call_operand.vmem [shape: f32[2,8,16], index: 1, kind: input, shape index: {}]   ;;  %s534_s2 = inlined_call_operand.vmem [shape: f32[2,8,16], index: 2, kind: output, shape index: {}]  }
   0x1   :  { %s498_s11 = smov 0  }
   0x2 LB: > { %s31_s12 = sadd.s32 1, %s471_s10  ;;  %p413_p0 = scmp.ge.s32.totalorder %s475_s11, 1  ;;  %s475_s11 = sphi %s498_s11, %s12_s11   ;;  %s471_s10 = sphi %s496_s10, %s536_s10   ;;  %s467_s9 = sphi %s494_s9, %s535_s9  }
   0x3   : > { %p33_p1 = scmp.ge.s32.totalorder %s31_s12, 2  ;;  %p153_p2 = scmp.lt.s32.totalorder %s475_s11, 3 }
   0x5   : > { %s538_s12 = smov (%p33_p1, %s31_s12), 0  ;;  %p154_p3 = pnand %p413_p0, %p153_p2 }
   0x6   : > { %p189_p4 = scmp.lt.s32.totalorder (!%p154_p3), %s467_s9, 1  ;;  %v477_v0 = vmov (!%p154_p3), 0.0   ;;  %vm478_vm0 = vmmov (!%p154_p3), 0   ;;  %vm215_vm1 = vcmask (!%p154_p3), 64512   ;;  %vm294_vm2 = vcmask (!%p154_p3), 130048  }
   0x7   : > { %157 = sbr.rel (%p154_p3) target bundleno = 240 (0xf0), region = 28  ;;  %422 = vmatprep.subr.mxu0 (!%p154_p3), %v477_v0  ;;  %424 = vmatprep.mubr.msk.f32.mxu0 (!%p154_p3), %vm478_vm0, %v477_v0 }
   0xe   : > { %s540_s9 = smov (!%p189_p4, %s467_s9), 1 }
   0xf   : > { %s414_s13 = sshll.u32 %s540_s9, 3 }
  0x10   : > { %s202_s16 = scalar_lea.vmem %s533_s1, %s414_s13  ;;  %s195_s19 = scalar_lea.vmem %s532_s0, %s414_s13 }
  0x11   : > { %v214_v1 = vld [vmem:[%s202_s16] sm:$0xff]  ;;  %s212_s22 = scalar_lea.vmem %s534_s2, %s414_s13 }
  0x12   : > { %423 = vmatpush3.msra.mxu0 %v214_v1  ;;  %v213_v2 = vld [vmem:[%s195_s19] sm:$0xff]  ;;  %v293_v5 = vmul.f32 %v214_v1, %v214_v1 }
  0x13   : > { %425 = vmatmul.mubr.msk.f32.vlgmr.msra.gmra.mrb[0].mxu0 %vm215_vm1, %v213_v2  ;;  %v289_v3 = vmul.f32 %v213_v2, %v213_v2 }
  0x14   : > { %v295_v6 = vsel %vm294_vm2, %v293_v5, 0.0 }
  0x15   : > { %v290_v4 = vsel %vm215_vm1, %v289_v3, 0.0  ;;  %v296_v7 = vrot.slane %v295_v6, 4 }
  0x16   : > { %291 = vadd.xlane.f32.xlu0 %v290_v4 }
  0x17   : > { %v297_v8 = vadd.f32 %v296_v7, %v295_v6 }
  0x19   : > { %v298_v9 = vrot.slane %v297_v8, 2 }
  0x1b   : > { %v299_v10 = vadd.f32 %v298_v9, %v297_v8 }
  0x1d   : > { %v300_v11 = vrot.slane %v299_v10, 1 }
  0x1f   : > { %v301_v16 = vadd.f32 %v300_v11, %v299_v10 }
  0xa3   : > { %v292_v13 = vpop.xlane.xlu0 %291 }
  0xe6   : > { %v285_v12 = vpop.f32.mrb[0].mxu0 }
  0xe7   : > { %v302_v14 = vmul.f32 2.0, %v285_v12  ;;  %v426_v15 = vpop.f32.mrb[1].mxu0 }
  0xe9   : > { %v303_v17 = vsub.f32 %v292_v13, %v302_v14 }
  0xeb   : > { %v304_v18 = vadd.f32 %v303_v17, %v301_v16 }
  0xed   : > { %v305_v19 = vsub.f32 0.0, %v304_v18 }
  0xef   : > { %306 = vst.msk [vmem:[%s212_s22] sm:$0xff] %vm294_vm2, %v305_v19 }
  0xf0 PF: > { %s12_s11 = sadd.s32 1, %s475_s11   ;;  %s535_s9 = smov %s471_s10 }
  0xf1   : > { %p9_p5 = scmp.ge.s32.totalorder %s12_s11, 4   ;;  %s536_s10 = smov %s538_s12 }
  0xf3   :  { %11 = sbr.rel (!%p9_p5) target bundleno = 2 (0x2), region = 61 }

// kernel: transition_down.5
= control target key start
LH: loop header
LB: loop body
LE: loop exit
PB: predicated region body
PF: predicated region fallthrough
CT: control target
= control target key end

     0   :  { %10 = vsyncpa [#allocation3], 0  ;;  %s1025_s0 = inlined_call_operand.vmem [shape: bf16[2,8,8,6], index: 0, kind: input, shape index: {}]   ;;  %s1026_s1 = inlined_call_operand.vmem [shape: bf16[6,32], index: 1, kind: input, shape index: {}]   ;;  %s1027_s2 = inlined_call_operand.vmem [shape: f32[1,32], index: 2, kind: input, shape index: {}]   ;;  %s1028_s3 = inlined_call_operand.vmem [shape: bf16[32,128], index: 3, kind: input, shape index: {}]   ;;  %s1029_s4 = inlined_call_operand.vmem [shape: f32[1,128], index: 4, kind: input, shape index: {}]   ;;  %s1030_s5 = inlined_call_operand.hbm [shape: f32[2,8,128], index: 5, kind: output, shape index: {}]  }
   0x1   :  { %12 = vsyncpa [#allocation3 + $0x1], 0  ;;  %s889_s18 = smov 0   ;;  %s891_s19 = smov 0  }
   0x2   :  { %s893_s20 = smov 0   ;;  %s895_s21 = smov 0  }
   0x3   :  { %s897_s22 = smov 0   ;;  %s899_s23 = smov 0  }
   0x4 LB: > { %s654_s24 = sadd.s32 4294967295, %s856_s23   ;;  %s655_s25 = sadd.s32 4294967294, %s856_s23   ;;  %s856_s23 = sphi %s899_s23, %s18_s23   ;;  %s852_s22 = sphi %s897_s22, %s1037_s22   ;;  %s848_s21 = sphi %s895_s21, %s1036_s21   ;;  %s844_s20 = sphi %s893_s20, %s1035_s20   ;;  %s840_s19 = sphi %s891_s19, %s1034_s19   ;;  %s836_s18 = sphi %s889_s18, %s1033_s18  }
   0x5   : > { %s30_s26 = sadd.s32 1, %s852_s22  ;;  %s151_s27 = sadd.s32 1, %s844_s20 }
   0x6   : > { %p32_p0 = scmp.ge.s32.totalorder %s30_s26, 2  ;;  %p161_p1 = scmp.ne.s32.totalorder %s844_s20, %s840_s19 }
   0x7   : > { %p162_p2 = scmp.eq.s32.totalorder %s654_s24, 1  ;;  %p167_p3 = scmp.ne.s32.totalorder %s840_s19, %s836_s18 }
   0x8   : > { %s1039_s26 = smov (%p32_p0, %s30_s26), 0  ;;  %p168_p5 = scmp.eq.s32.totalorder %s655_s25, 1 }
   0x9   : > { %p929_p4 = por %p162_p2, %p161_p1  ;;  %s146_s29 = ssub.s32 %s852_s22, %s1039_s26 }
   0xa   : > { %p658_p6 = scmp.ge.s32.totalorder %s856_s23, 1  ;;  %p149_p7 = scmp.eq.s32.totalorder %s146_s29, 0 }
   0xb   : > { %p936_p8 = por %p168_p5, %p167_p3  ;;  %p211_p9 = scmp.lt.s32.totalorder %s856_s23, 3 }
   0xc   : > { %s942_s6 = scalar_select %p149_p7, %s844_s20, %s151_s27  }
   0xd   : > { %p212_p10 = pnand %p658_p6, %p211_p9 }
   0xe   : > { %v262_v0 = vld [vmem:[%s1026_s1] sm:$0x7] (!%p212_p10)  ;;  %vm303_vm0 = vcmask (!%p212_p10), 1042432   ;;  %p244_p11 = scmp.lt.s32.totalorder (!%p212_p10), %s848_s21, 1  ;;  %vm290_vm1 = vcmask (!%p212_p10), 48128   ;;  %v777_v7 = vld [vmem:[%s1028_s3 + $0x8] sm:$0xff] (!%p212_p10)  }
   0xf   : > { %215 = sbr.rel (%p212_p10) target bundleno = 506 (0x1fa), region = 40  ;;  %716 = vmatprep.subr.msk.bf16.mxu0 (!%p212_p10), %vm303_vm0, %v262_v0  ;;  %v305_v1 = vsel (!%p212_p10), %vm303_vm0, %v262_v0, 0  ;;  %v776_v6 = vld [vmem:[%s1028_s3] sm:$0xff] (!%p212_p10)   ;;  %vm407_vm2 = vcmask (!%p212_p10), 261120   ;;  %vm549_vm3 = vcmask (!%p212_p10), 1041409   ;;  %vm551_vm4 = vcmask (!%p212_p10), 1042434  }
  0x10   : > { %695 = vmatpush3.bf16.msra.mxu0 (!%p212_p10), %v305_v1  ;;  %704 = vmatprep.subr.bf16.mxu1 (!%p212_p10), %v776_v6  ;;  %v662_v8 = vld [vmem:[%s1027_s2] ss:$0 sm:$0xff] (!%p212_p10)  ;;  %s240_s7 = sand.u32 (!%p212_p10), 1, %s840_s19   ;;  %vm553_vm5 = vcmask (!%p212_p10), 1043459   ;;  %vm555_vm6 = vcmask (!%p212_p10), 1044484   ;;  %vm557_vm7 = vcmask (!%p212_p10), 1045509  }
  0x11   : > { %705 = vmatpush3.bf16.msra.mxu1 (!%p212_p10), %v776_v6  ;;  %v671_v37 = vld [vmem:[%s1029_s4] ss:$0 sm:$0xff] (!%p212_p10)  ;;  %s659_s8 = sshll.u32 (!%p212_p10), %s240_s7, 3  ;;  %vm559_vm8 = vcmask (!%p212_p10), 1046534   ;;  %vm561_vm9 = vcmask (!%p212_p10), 1047559   ;;  %s858_s16 = smov (!%p212_p10), [#allocation2]  }
  0x12   : > { %706 = vmatprep.subr.bf16.mxu1 (!%p212_p10), %v777_v7  ;;  %s782_s17 = sshll.u32 (!%p212_p10), %s858_s16, 4  ;;  %s783_s17 = int_to_ptr.vmem [resolvable:$false] %s782_s17 }
  0x13   : > { %s784_s24 = scalar_lea.vmem (!%p212_p10), %s783_s17, 256 }
  0x15   : > { %707 = vmatpush3.bf16.msra.mxu1 (!%p212_p10), %v777_v7 }
  0x16   : > { %s245_s9 = scalar_select %p244_p11, %s848_s21, 1 }
  0x18   : > { %s682_s10 = sshll.u32 %s245_s9, 5  ;;  %s679_s9 = sshll.u32 %s848_s21, 7 }
  0x19   : > { %s251_s13 = scalar_lea.vmem %s1025_s0, %s682_s10  ;;  %s242_s10 = scalar_lea.vmem [#allocation2], %s659_s8 }
  0x1a   : > { %v772_v2 = vld [vmem:[%s251_s13] sm:$0xff]   ;;  %v773_v3 = vld [vmem:[%s251_s13 + $0x8] sm:$0xff]   ;;  %v774_v4 = vld [vmem:[%s251_s13 + $0x10] sm:$0xff]   ;;  %s580_s11 = sshll.u32 %s242_s10, 4  ;;  %s976_s14 = scalar_lea.hbm %s1030_s5, %s679_s9  ;;  %s978_s11 = int_to_ptr.vmem [resolvable:$true] %s580_s11 }
  0x1b   : > { %696 = vmatprep.mubr.msk.bf16.mxu0 %vm290_vm1, %v772_v2  ;;  %v775_v5 = vld [vmem:[%s251_s13 + $0x18] sm:$0xff]   ;;  %s566_s21 = scalar_lea.sflag [#allocation3], %s240_s7  ;;  %s778_s15 = scalar_lea.vmem %s978_s11, 128 }
  0x1c   : > { %697 = vmatmul.mubr.msk.bf16.vlgmr.msra.gmra.mrb[0].mxu0 %vm290_vm1, %v773_v3  ;;  %p779_p12 = scmp.ne.s32.totalorder %s978_s11, %s778_s15  ;;  %p785_p1 = scmp.lt.s32.totalorder %s978_s11, %s783_s17 }
  0x1d   : > { %700 = vmatprep.mubr.msk.bf16.mxu0 %vm290_vm1, %v774_v4  ;;  %p786_p2 = scmp.lt.s32.totalorder %s784_s24, %s778_s15 }
  0x1e   : > { %p780_p13 = pnand %p779_p12, %p929_p4 }
  0x1f   : > { %p787_p3 = por %p786_p2, %p785_p1 }
  0x20   : > { %p781_p0 = pneg %p780_p13 }
  0x22   : > { %p788_p5 = pnand %p787_p3, %p781_p0 }
  0x24   : > { %701 = vmatmul.mubr.msk.bf16.gmra.mrb[4].mxu0 %vm290_vm1, %v775_v5 }
  0xef   : > { %v698_v9 = vpop.f32.mrb[0].mxu0 }
  0xf0   : > { %v350_v10 = vadd.f32 %v698_v9, %v662_v8  ;;  %v341_v11 = vpop.f32.mrb[1].mxu0 }
  0xf1   : > { %v342_v12 = vadd.f32 %v662_v8, %v341_v11  ;;  %v699_v13 = vpop.f32.mrb[2].mxu0 }
  0xf2   : > { %v353_v14 = vadd.f32 %v699_v13, %v662_v8  ;;  %v344_v15 = vpop.f32.mrb[3].mxu0  ;;  %v374_v17 = vmax.f32 %v350_v10, 0.0 }
  0xf3   : > { %v345_v16 = vadd.f32 %v662_v8, %v344_v15  ;;  %v372_v19 = vmax.f32 %v342_v12, 0.0 }
  0xf4   : > { %v375_v18 = vmax.f32 %v353_v14, 0.0 }
  0xf5   : > { %v373_v20 = vmax.f32 %v345_v16, 0.0 }
  0xf6   : > { %v386_v21 = vpack.c.bf16 %v375_v18, %v374_v17 }
  0xf7   : > { %v702_v22 = vpop.f32.mrb[4].mxu0  ;;  %v385_v23 = vpack.c.bf16 %v373_v20, %v372_v19 }
  0xf8   : > { %v366_v24 = vadd.f32 %v702_v22, %v662_v8  ;;  %v357_v25 = vpop.f32.mrb[5].mxu0 }
  0xf9   : > { %v358_v26 = vadd.f32 %v662_v8, %v357_v25  ;;  %v703_v27 = vpop.f32.mrb[6].mxu0  ;;  %708 = vmatprep.mubr.msk.bf16.mxu1 %vm407_vm2, %v385_v23 }
  0xfa   : > { %v369_v28 = vadd.f32 %v703_v27, %v662_v8  ;;  %v360_v29 = vpop.f32.mrb[7].mxu0  ;;  %709 = vmatmul.mubr.msk.bf16.vlgmr.msra.gmra.mrb[0].mxu1 %vm407_vm2, %v386_v21  ;;  %v378_v31 = vmax.f32 %v366_v24, 0.0 }
  0xfb   : > { %v361_v30 = vadd.f32 %v662_v8, %v360_v29  ;;  %v376_v33 = vmax.f32 %v358_v26, 0.0 }
  0xfc   : > { %v379_v32 = vmax.f32 %v369_v28, 0.0 }
  0xfd   : > { %v377_v34 = vmax.f32 %v361_v30, 0.0 }
  0xfe   : > { %v388_v35 = vpack.c.bf16 %v379_v32, %v378_v31 }
  0xff   : > { %v387_v36 = vpack.c.bf16 %v377_v34, %v376_v33 }
 0x101   : > { %712 = vmatprep.mubr.msk.bf16.mxu1 %vm407_vm2, %v387_v36 }
 0x102   : > { %713 = vmatmul.mubr.msk.bf16.gmra.mrb[4].mxu1 %vm407_vm2, %v388_v35 }
 0x1cd   : > { %v710_v38 = vpop.f32.mrb[0].mxu1 }
 0x1ce   : > { %v463_v39 = vadd.f32 %v710_v38, %v671_v37  ;;  %v454_v40 = vpop.f32.mrb[1].mxu1 }
 0x1cf   : > { %v455_v41 = vadd.f32 %v671_v37, %v454_v40  ;;  %v711_v42 = vpop.f32.mrb[2].mxu1 }
 0x1d0   : > { %v487_v43 = vmax.f32 %v463_v39, 0.0  ;;  %v466_v44 = vadd.f32 %v711_v42, %v671_v37  ;;  %v457_v45 = vpop.f32.mrb[3].mxu1 }
 0x1d1   : > { %v485_v46 = vmax.f32 %v455_v41, 0.0  ;;  %v458_v47 = vadd.f32 %v671_v37, %v457_v45 }
 0x1d2   : > { %v505_v48 = vrot.slane %v487_v43, 4  ;;  %v488_v49 = vmax.f32 %v466_v44, 0.0 }
 0x1d3   : > { %v493_v50 = vrot.slane %v485_v46, 4  ;;  %v486_v51 = vmax.f32 %v458_v47, 0.0 }
 0x1d4   : > { %v506_v52 = vmax.f32 %v487_v43, %v505_v48  ;;  %v511_v53 = vrot.slane %v488_v49, 4 }
 0x1d5   : > { %v494_v54 = vmax.f32 %v485_v46, %v493_v50  ;;  %v499_v55 = vrot.slane %v486_v51, 4  ;;  %v714_v56 = vpop.f32.mrb[4].mxu1 }
 0x1d6   : > { %v507_v57 = vrot.slane %v506_v52, 2  ;;  %v512_v58 = vmax.f32 %v488_v49, %v511_v53  ;;  %v479_v59 = vadd.f32 %v714_v56, %v671_v37  ;;  %v470_v60 = vpop.f32.mrb[5].mxu1 }
 0x1d7   : > { %v495_v61 = vrot.slane %v494_v54, 2  ;;  %v500_v62 = vmax.f32 %v486_v51, %v499_v55  ;;  %v471_v63 = vadd.f32 %v671_v37, %v470_v60  ;;  %v715_v0 = vpop.f32.mrb[6].mxu1 }
 0x1d8   : > { %v508_v1 = vmax.f32 %v506_v52, %v507_v57  ;;  %v513_v2 = vrot.slane %v512_v58, 2  ;;  %v491_v3 = vmax.f32 %v479_v59, 0.0  ;;  %v482_v4 = vadd.f32 %v715_v0, %v671_v37  ;;  %v473_v5 = vpop.f32.mrb[7].mxu1 }
 0x1d9   : > { %v496_v6 = vmax.f32 %v494_v54, %v495_v61  ;;  %v501_v7 = vrot.slane %v500_v62, 2  ;;  %v489_v8 = vmax.f32 %v471_v63, 0.0  ;;  %v474_v9 = vadd.f32 %v671_v37, %v473_v5 }
 0x1da   : > { %v514_v10 = vmax.f32 %v512_v58, %v513_v2  ;;  %v529_v11 = vrot.slane %v491_v3, 4  ;;  %v492_v12 = vmax.f32 %v482_v4, 0.0  ;;  %v509_v17 = vrot.slane %v508_v1, 1 }
 0x1db   : > { %v497_v13 = vrot.slane %v496_v6, 1  ;;  %v502_v14 = vmax.f32 %v500_v62, %v501_v7  ;;  %v517_v15 = vrot.slane %v489_v8, 4  ;;  %v490_v16 = vmax.f32 %v474_v9, 0.0 }
 0x1dc   : > { %v530_v18 = vmax.f32 %v491_v3, %v529_v11  ;;  %v535_v19 = vrot.slane %v492_v12, 4  ;;  %v515_v20 = vrot.slane %v514_v10, 1  ;;  %v510_v30 = vmax.f32 %v508_v1, %v509_v17 }
 0x1dd   : > { %v503_v21 = vrot.slane %v502_v14, 1  ;;  %v518_v22 = vmax.f32 %v489_v8, %v517_v15  ;;  %v523_v23 = vrot.slane %v490_v16, 4  ;;  %v498_v26 = vmax.f32 %v496_v6, %v497_v13 }
 0x1de   : > { %v531_v24 = vrot.slane %v530_v18, 2  ;;  %v536_v25 = vmax.f32 %v492_v12, %v535_v19  ;;  %v516_v33 = vmax.f32 %v514_v10, %v515_v20 }
 0x1df   : > { %v504_v27 = vmax.f32 %v502_v14, %v503_v21  ;;  %v519_v28 = vrot.slane %v518_v22, 2  ;;  %v524_v29 = vmax.f32 %v490_v16, %v523_v23 }
 0x1e0   : > { %v532_v31 = vmax.f32 %v530_v18, %v531_v24  ;;  %v537_v32 = vrot.slane %v536_v25, 2 }
 0x1e1   : > { %v550_v34 = vsel %vm549_vm3, %v504_v27, %v498_v26  ;;  %v520_v35 = vmax.f32 %v518_v22, %v519_v28  ;;  %v525_v36 = vrot.slane %v524_v29, 2 }
 0x1e2   : > { %v552_v37 = vsel %vm551_vm4, %v510_v30, %v550_v34  ;;  %v538_v38 = vmax.f32 %v536_v25, %v537_v32  ;;  %v533_v42 = vrot.slane %v532_v31, 1 }
 0x1e3   : > { %v521_v39 = vrot.slane %v520_v35, 1  ;;  %v526_v40 = vmax.f32 %v524_v29, %v525_v36  ;;  %v554_v41 = vsel %vm553_vm5, %v516_v33, %v552_v37 }
 0x1e4   : > { %v539_v44 = vrot.slane %v538_v38, 1  ;;  %v534_v48 = vmax.f32 %v532_v31, %v533_v42 }
 0x1e5   : > { %v522_v43 = vmax.f32 %v520_v35, %v521_v39  ;;  %v527_v45 = vrot.slane %v526_v40, 1 }
 0x1e6   : > { %v540_v49 = vmax.f32 %v538_v38, %v539_v44 }
 0x1e7   : > { %v528_v46 = vmax.f32 %v526_v40, %v527_v45  ;;  %v556_v47 = vsel %vm555_vm6, %v522_v43, %v554_v41 }
 0x1e9   : > { %v558_v50 = vsel %vm557_vm7, %v528_v46, %v556_v47 }
 0x1ea   : > { %v560_v51 = vsel %vm559_vm8, %v534_v48, %v558_v50 }
 0x1eb   : > { %v562_v52 = vsel %vm561_vm9, %v540_v49, %v560_v51 }
 0x1ec   : > { %564 = vst [vmem:[%s242_s10] sm:$0xff] %v562_v52 }
 0x1ed   : > { %791 = shalt.err (!%p788_p5)
}
 0x1ee   : > { %s792_s25 = scalar_lea.hbm %s976_s14, 128  ;;  %s796_s7 = scalar_lea.hbm %s1030_s5, 256 }
 0x1ef   : > { %p793_p6 = scmp.ne.s32.totalorder %s976_s14, %s792_s25  ;;  %p797_p10 = scmp.lt.u32.totalorder %s976_s14, %s1030_s5 }
 0x1f0   : > { %p798_p11 = scmp.lt.u32.totalorder %s796_s7, %s792_s25  ;;  %p800_p13 = scmp.lt.u32.totalorder %s792_s25, %s976_s14 }
 0x1f1   : > { %p794_p7 = pnand %p793_p6, %p929_p4 }
 0x1f2   : > { %p799_p12 = por %p798_p11, %p797_p10 }
 0x1f3   : > { %p795_p9 = pneg %p794_p7 }
 0x1f4   : > { %p801_p0 = por %p800_p13, %p799_p12 }
 0x1f6   : > { %p802_p1 = pnand %p801_p0, %p795_p9 }
 0x1f8   : > { %805 = shalt.err (!%p802_p1)
}
 0x1f9   : > { %717 = dma.vmem_to_hbm [thread:$0]  (%p929_p4), %s978_s11, 128, %s976_s14, %s566_s21  }
 0x1fa PF: > { %p723_p2 = scmp.ge.s32.totalorder %s856_s23, 2  ;;  %s592_s10 = sand.u32 1, %s836_s18  }
 0x1fb   : > { %s593_s12 = scalar_lea.sflag [#allocation3], %s592_s10 }
 0x1fc   : > { %p720_p3 = pnand %p723_p2, %p936_p8 }
 0x1fe   : > { %831 = dma.done.wait (!%p720_p3), %s593_s12, 128  }
 0x1ff   : > { %833 = vsyncadd (!%p720_p3), %s593_s12, 4294967168  ;;  %s18_s23 = sadd.s32 1, %s856_s23   ;;  %s1033_s18 = smov %s840_s19 }
 0x200   : > { %p15_p5 = scmp.ge.s32.totalorder %s18_s23, 4   ;;  %s1034_s19 = smov %s844_s20 }
 0x201   : > { %s1035_s20 = smov %s942_s6  ;;  %s1036_s21 = smov %s852_s22 }
 0x202   : > { %s1037_s22 = smov %s1039_s26  ;;  %17 = sbr.rel (!%p15_p5) target bundleno = 4 (0x4), region = 75 }
 0x209   :  { %598 = vsyncpa [#allocation3], 1 }
 0x20a   :  { %600 = vsyncpa [#allocation3 + $0x1], 1 }

</bundles_post_ra>
